<compile_context>
chip_gen: v7x
topology: tpu7x:2x2x1
jax: 0.10.0
libtpu: 0.0.40
codegen_flags: <defaults>
</compile_context>

<pallas_src>
import jax
import jax.numpy as jnp
from jax.experimental import pallas as pl
from jax.experimental.pallas import tpu as pltpu


def _round_up(n, m):
    return ((n + m - 1) // m) * m


def _make_bank_kernel(n_parts):
    """Kernel arg order: [x_part_0..n-1, w2, b2, w3, b3, w4r, b4, out]."""

    def kernel(*refs):
        part_refs = refs[:n_parts]
        w2_ref, b2_ref, w3_ref, b3_ref, w4r_ref, b4_ref, o_ref = refs[n_parts:]

        # --- fc2, torch.cat fused -------------------------------------------
        # Lane-concat the bf16 parts in VMEM (cheap VPU/XLU work), then one
        # K=60 MXU dot with f32 accumulation.
        x_cat = jnp.concatenate(
            [p[...].astype(jnp.bfloat16) for p in part_refs], axis=-1)
        h2 = jnp.dot(x_cat, w2_ref[...],
                     preferred_element_type=jnp.float32) + b2_ref[...]
        h2 = jnp.maximum(h2, 0.0)                                   # (TB, 60)

        # --- fc3 --------------------------------------------------------------
        h3 = jnp.dot(h2.astype(jnp.bfloat16), w3_ref[...],
                     preferred_element_type=jnp.float32) + b3_ref[...]
        h3 = jnp.maximum(h3, 0.0)                                   # (TB, 10)

        # --- fc4 + sigmoid, lane-major ---------------------------------------
        # (8,10) x (TB,10)^T -> (8,TB); only row 0 is meaningful (w4 is
        # replicated across the 8 sublanes purely for alignment).  Keeps the
        # batch dim on lanes: dense sigmoid, dense unmasked store.  Extra MXU
        # cost is only ~TB/256 pushes and the MXU has slack here.
        z8 = jax.lax.dot_general(
            w4r_ref[...], h3.astype(jnp.bfloat16),
            dimension_numbers=(((1,), (1,)), ((), ())),
            preferred_element_type=jnp.float32)                     # (8, TB)
        z = z8[0:1, :] + b4_ref[...]                                # (1, TB)
        o_ref[...] = jax.nn.sigmoid(z)                              # dense vst

    return kernel


def bank_model_fuse(x_parts, params, *, tile_b=4096):
    """Forward pass of BankModelFuse.

    x_parts: list/tuple of (B, f_i) float arrays with sum(f_i) == 60
             (the torch.cat glue, fused into a single in-kernel lane concat).
    params : dict with w2 (60,60), b2 (1,60), w3 (60,10), b3 (1,10),
             w4 (10,1), b4 (1,1)   [weights stored as (in, out)]
    returns: (B, 1) float32 sigmoid output.
    """
    x_parts = [jnp.asarray(p) for p in x_parts]      # keep caller dtype (f32/bf16)
    n_parts = len(x_parts)
    B = int(x_parts[0].shape[0])
    feats = [int(p.shape[1]) for p in x_parts]
    f_total = sum(feats)

    w2 = jnp.asarray(params["w2"], jnp.float32)
    assert w2.shape[0] == f_total, "sum of part feature dims must match W2 rows"

    w2 = w2.astype(jnp.bfloat16)                                     # (60, 60)
    w3 = jnp.asarray(params["w3"], jnp.float32).astype(jnp.bfloat16)  # (60, 10)
    b2 = jnp.asarray(params["b2"], jnp.float32).reshape(1, -1)        # (1, 60)
    b3 = jnp.asarray(params["b3"], jnp.float32).reshape(1, -1)        # (1, 10)
    # fc4 weight row replicated to 8 sublanes (alignment only; row 0 is used).
    w4r = jnp.tile(jnp.asarray(params["w4"], jnp.float32).reshape(1, -1),
                   (8, 1)).astype(jnp.bfloat16)                       # (8, 10)
    b4 = jnp.asarray(params["b4"], jnp.float32).reshape(1, 1)         # (1, 1)

    # Batch tiling: large tiles amortize the ~0.35 us/step grid overhead;
    # multiple of 256 keeps bf16 sublane packing and the (1, tile_b) output
    # block (lane multiple of 128) clean.  Clamp for tiny B.
    tile_b = max(256, min(int(tile_b), _round_up(B, 256)))
    tile_b = _round_up(tile_b, 256)
    b_pad = _round_up(B, tile_b)
    if b_pad != B:
        x_parts = [jnp.pad(p, ((0, b_pad - B), (0, 0))) for p in x_parts]
    grid = (b_pad // tile_b,)

    # x parts stream through the grid (double-buffered HBM->VMEM DMA);
    # weights/biases use a constant index_map so they stay VMEM-resident.
    part_specs = [pl.BlockSpec((tile_b, f), lambda i: (i, 0)) for f in feats]
    const_map = lambda i: (0, 0)
    weight_args = [w2, b2, w3, b3, w4r, b4]
    weight_specs = [pl.BlockSpec(tuple(w.shape), const_map) for w in weight_args]

    flops = 2 * B * (f_total * 60 + 60 * 10 + 10 * 1)
    bytes_accessed = (
        B * (sum(f * p.dtype.itemsize for f, p in zip(feats, x_parts)) + 4)
        + sum(int(w.size) * w.dtype.itemsize for w in weight_args))
    cost = pl.CostEstimate(flops=flops, transcendentals=B,
                           bytes_accessed=int(bytes_accessed))

    out = pl.pallas_call(
        _make_bank_kernel(n_parts),
        out_shape=jax.ShapeDtypeStruct((1, b_pad), jnp.float32),
        grid=grid,
        in_specs=part_specs + weight_specs,
        out_specs=pl.BlockSpec((1, tile_b), lambda i: (0, i)),
        compiler_params=pltpu.CompilerParams(
            dimension_semantics=("parallel",),      # shard batch across TCs
            vmem_limit_bytes=32 * 1024 * 1024),     # cover v5e's 16 MiB default
        cost_estimate=cost,
    )(*x_parts, *weight_args)

    # (1, b_pad) lane-major row -> (B, 1), dropping padded rows.
    return out[0, :B].reshape(B, 1)


def init_params(key):
    """Deterministic init mirroring nn.Linear shapes (stored as (in, out))."""
    k2, k3, k4, kb2, kb3, kb4 = jax.random.split(key, 6)

    def uinit(k, shape, fan_in):
        bound = 1.0 / jnp.sqrt(fan_in)
        return jax.random.uniform(k, shape, jnp.float32, -bound, bound)

    return {
        "w2": uinit(k2, (60, 60), 60.0),
        "b2": uinit(kb2, (1, 60), 60.0),
        "w3": uinit(k3, (60, 10), 60.0),
        "b3": uinit(kb3, (1, 10), 60.0),
        "w4": uinit(k4, (10, 1), 10.0),
        "b4": uinit(kb4, (1, 1), 10.0),
    }


if __name__ == "__main__":
    key = jax.random.PRNGKey(0)
    kp, kx1, kx2 = jax.random.split(key, 3)

    params = init_params(kp)

    # Two parties of 30 features each (cat -> 60).  Non-multiple-of-tile batch
    # with a small explicit tile to exercise the grid (2 steps), padding, and
    # the lane-dense output reshaping/slicing.
    B = 300
    x_a = jax.random.normal(kx1, (B, 30), jnp.float32)
    x_b = jax.random.normal(kx2, (B, 30), jnp.float32)

    out = bank_model_fuse([x_a, x_b], params, tile_b=256)   # grid = (2,)
    out = jax.block_until_ready(out)

    # Pure-JAX f32 reference (kernel uses bf16 operands on the MXU with f32
    # accumulation, hence the loose tolerance).
    x_full = jnp.concatenate([x_a, x_b], axis=1)
    h = jnp.maximum(x_full @ params["w2"] + params["b2"], 0.0)
    h = jnp.maximum(h @ params["w3"] + params["b3"], 0.0)
    ref = jax.nn.sigmoid(h @ params["w4"] + params["b4"])

    assert out.shape == (B, 1), out.shape
    assert bool(jnp.all(jnp.isfinite(out)))
    assert jnp.allclose(out, ref, atol=2e-2, rtol=2e-2), (
        float(jnp.max(jnp.abs(out - ref))))

    print("KERNEL_OK")
</pallas_src>

<mosaic_0001>
module attributes {stable_mosaic.version = 11 : i64} {
  func.func @kernel(%arg0: i32, %arg1: memref<256x30xf32, #tpu.memory_space<vmem>>, %arg2: memref<256x30xf32, #tpu.memory_space<vmem>>, %arg3: memref<60x60xbf16, #tpu.memory_space<vmem>>, %arg4: memref<1x60xf32, #tpu.memory_space<vmem>>, %arg5: memref<60x10xbf16, #tpu.memory_space<vmem>>, %arg6: memref<1x10xf32, #tpu.memory_space<vmem>>, %arg7: memref<8x10xbf16, #tpu.memory_space<vmem>>, %arg8: memref<1x1xf32, #tpu.memory_space<vmem>>, %arg9: memref<1x256xf32, #tpu.memory_space<vmem>>) attributes {dimension_semantics = [#tpu.dimension_semantics<parallel>], iteration_bounds = array<i64: 2>, scalar_prefetch = 0 : i64, scratch_operands = 0 : i64, tpu.core_type = #tpu.core_type<tc>, window_params = [{transform_indices = @transform_0, window_bounds = array<i64: 256, 30>}, {transform_indices = @transform_1, window_bounds = array<i64: 256, 30>}, {pipeline_mode = #tpu.pipeline_mode<synchronous>, transform_indices = @transform_2, window_bounds = array<i64: 60, 60>}, {pipeline_mode = #tpu.pipeline_mode<synchronous>, transform_indices = @transform_3, window_bounds = array<i64: 1, 60>}, {pipeline_mode = #tpu.pipeline_mode<synchronous>, transform_indices = @transform_4, window_bounds = array<i64: 60, 10>}, {pipeline_mode = #tpu.pipeline_mode<synchronous>, transform_indices = @transform_5, window_bounds = array<i64: 1, 10>}, {pipeline_mode = #tpu.pipeline_mode<synchronous>, transform_indices = @transform_6, window_bounds = array<i64: 8, 10>}, {pipeline_mode = #tpu.pipeline_mode<synchronous>, transform_indices = @transform_7, window_bounds = array<i64: 1, 1>}, {transform_indices = @transform_8, window_bounds = array<i64: 1, 256>}]} {
    %c0 = arith.constant 0 : index
    %c0_0 = arith.constant 0 : index
    %0 = vector.load %arg1[%c0, %c0_0] : memref<256x30xf32, #tpu.memory_space<vmem>>, vector<256x30xf32>
    %1 = arith.truncf %0 : vector<256x30xf32> to vector<256x30xbf16>
    %c0_1 = arith.constant 0 : index
    %c0_2 = arith.constant 0 : index
    %2 = vector.load %arg2[%c0_1, %c0_2] : memref<256x30xf32, #tpu.memory_space<vmem>>, vector<256x30xf32>
    %3 = arith.truncf %2 : vector<256x30xf32> to vector<256x30xbf16>
    %4 = tpu.concatenate %1, %3 in 1 : vector<256x30xbf16>, vector<256x30xbf16> -> vector<256x60xbf16>
    %c0_3 = arith.constant 0 : index
    %c0_4 = arith.constant 0 : index
    %5 = vector.load %arg3[%c0_3, %c0_4] : memref<60x60xbf16, #tpu.memory_space<vmem>>, vector<60x60xbf16>
    %cst = arith.constant dense<0.000000e+00> : vector<256x60xf32>
    %6 = tpu.matmul %4, %5, %cst {dimension_numbers = #tpu.dot_dimension_numbers<[1], [0], [0], [1], [0, 0, 1, 1], [], []>} : vector<256x60xbf16>, vector<60x60xbf16>, vector<256x60xf32> -> vector<256x60xf32>
    %c0_5 = arith.constant 0 : index
    %c0_6 = arith.constant 0 : index
    %7 = vector.load %arg4[%c0_5, %c0_6] : memref<1x60xf32, #tpu.memory_space<vmem>>, vector<1x60xf32>
    %8 = vector.broadcast %7 : vector<1x60xf32> to vector<256x60xf32>
    %9 = arith.addf %6, %8 : vector<256x60xf32>
    %cst_7 = arith.constant 0.000000e+00 : f32
    %10 = vector.broadcast %cst_7 : f32 to vector<256x60xf32>
    %11 = arith.maximumf %9, %10 : vector<256x60xf32>
    %12 = arith.truncf %11 : vector<256x60xf32> to vector<256x60xbf16>
    %c0_8 = arith.constant 0 : index
    %c0_9 = arith.constant 0 : index
    %13 = vector.load %arg5[%c0_8, %c0_9] : memref<60x10xbf16, #tpu.memory_space<vmem>>, vector<60x10xbf16>
    %cst_10 = arith.constant dense<0.000000e+00> : vector<256x10xf32>
    %14 = tpu.matmul %12, %13, %cst_10 {dimension_numbers = #tpu.dot_dimension_numbers<[1], [0], [0], [1], [0, 0, 1, 1], [], []>} : vector<256x60xbf16>, vector<60x10xbf16>, vector<256x10xf32> -> vector<256x10xf32>
    %c0_11 = arith.constant 0 : index
    %c0_12 = arith.constant 0 : index
    %15 = vector.load %arg6[%c0_11, %c0_12] : memref<1x10xf32, #tpu.memory_space<vmem>>, vector<1x10xf32>
    %16 = vector.broadcast %15 : vector<1x10xf32> to vector<256x10xf32>
    %17 = arith.addf %14, %16 : vector<256x10xf32>
    %cst_13 = arith.constant 0.000000e+00 : f32
    %18 = vector.broadcast %cst_13 : f32 to vector<256x10xf32>
    %19 = arith.maximumf %17, %18 : vector<256x10xf32>
    %c0_14 = arith.constant 0 : index
    %c0_15 = arith.constant 0 : index
    %20 = vector.load %arg7[%c0_14, %c0_15] : memref<8x10xbf16, #tpu.memory_space<vmem>>, vector<8x10xbf16>
    %21 = arith.truncf %19 : vector<256x10xf32> to vector<256x10xbf16>
    %cst_16 = arith.constant dense<0.000000e+00> : vector<8x256xf32>
    %22 = tpu.matmul %20, %21, %cst_16 {dimension_numbers = #tpu.dot_dimension_numbers<[1], [1], [0], [0], [0, 0, 1, 0], [], []>} : vector<8x10xbf16>, vector<256x10xbf16>, vector<8x256xf32> -> vector<8x256xf32>
    %23 = vector.extract_strided_slice %22 {offsets = [0, 0], sizes = [1, 256], strides = [1, 1]} : vector<8x256xf32> to vector<1x256xf32>
    %c0_17 = arith.constant 0 : index
    %c0_18 = arith.constant 0 : index
    %24 = vector.load %arg8[%c0_17, %c0_18] : memref<1x1xf32, #tpu.memory_space<vmem>>, vector<1x1xf32>
    %25 = vector.broadcast %24 : vector<1x1xf32> to vector<1x256xf32>
    %26 = arith.addf %23, %25 : vector<1x256xf32>
    %27 = arith.negf %26 : vector<1x256xf32>
    %28 = math.exp %27 : vector<1x256xf32>
    %cst_19 = arith.constant 1.000000e+00 : f32
    %29 = vector.broadcast %cst_19 : f32 to vector<1x256xf32>
    %30 = arith.addf %29, %28 : vector<1x256xf32>
    %31 = arith.divf %29, %30 : vector<1x256xf32>
    %c0_20 = arith.constant 0 : index
    %c0_21 = arith.constant 0 : index
    %32 = vector.load %arg9[%c0_20, %c0_21] : memref<1x256xf32, #tpu.memory_space<vmem>>, vector<1x256xf32>
    tpu.vector_store %arg9[%c0_20, %c0_21], %31 {strides = array<i32>} : memref<1x256xf32, #tpu.memory_space<vmem>>, vector<1x256xf32>,
    return
  }
  func.func @transform_0(%arg0: i32) -> (i32, i32) {
    %c0_i32 = arith.constant 0 : i32
    %c0_i32_0 = arith.constant 0 : i32
    return %arg0, %c0_i32 : i32, i32
  }
  func.func @transform_1(%arg0: i32) -> (i32, i32) {
    %c0_i32 = arith.constant 0 : i32
    %c0_i32_0 = arith.constant 0 : i32
    return %arg0, %c0_i32 : i32, i32
  }
  func.func @transform_2(%arg0: i32) -> (i32, i32) {
    %c0_i32 = arith.constant 0 : i32
    %c0_i32_0 = arith.constant 0 : i32
    %c0_i32_1 = arith.constant 0 : i32
    return %c0_i32, %c0_i32_0 : i32, i32
  }
  func.func @transform_3(%arg0: i32) -> (i32, i32) {
    %c0_i32 = arith.constant 0 : i32
    %c0_i32_0 = arith.constant 0 : i32
    %c0_i32_1 = arith.constant 0 : i32
    return %c0_i32, %c0_i32_0 : i32, i32
  }
  func.func @transform_4(%arg0: i32) -> (i32, i32) {
    %c0_i32 = arith.constant 0 : i32
    %c0_i32_0 = arith.constant 0 : i32
    %c0_i32_1 = arith.constant 0 : i32
    return %c0_i32, %c0_i32_0 : i32, i32
  }
  func.func @transform_5(%arg0: i32) -> (i32, i32) {
    %c0_i32 = arith.constant 0 : i32
    %c0_i32_0 = arith.constant 0 : i32
    %c0_i32_1 = arith.constant 0 : i32
    return %c0_i32, %c0_i32_0 : i32, i32
  }
  func.func @transform_6(%arg0: i32) -> (i32, i32) {
    %c0_i32 = arith.constant 0 : i32
    %c0_i32_0 = arith.constant 0 : i32
    %c0_i32_1 = arith.constant 0 : i32
    return %c0_i32, %c0_i32_0 : i32, i32
  }
  func.func @transform_7(%arg0: i32) -> (i32, i32) {
    %c0_i32 = arith.constant 0 : i32
    %c0_i32_0 = arith.constant 0 : i32
    %c0_i32_1 = arith.constant 0 : i32
    return %c0_i32, %c0_i32_0 : i32, i32
  }
  func.func @transform_8(%arg0: i32) -> (i32, i32) {
    %c0_i32 = arith.constant 0 : i32
    %c0_i32_0 = arith.constant 0 : i32
    return %c0_i32, %arg0 : i32, i32
  }
}

</mosaic_0001>

<bundles_post_ra>
// kernel: tpu_custom_call.1
= control target key start
LH: loop header
LB: loop body
LE: loop exit
PB: predicated region body
PF: predicated region fallthrough
CT: control target
= control target key end

     0   :  { %s2109_s0 = inlined_call_operand.vmem [shape: f32[512,30], index: 0, kind: input, shape index: {}]   ;;  %s2110_s1 = inlined_call_operand.vmem [shape: f32[512,30], index: 1, kind: input, shape index: {}]   ;;  %s2111_s2 = inlined_call_operand.vmem [shape: bf16[60,60], index: 2, kind: input, shape index: {}]   ;;  %s2112_s3 = inlined_call_operand.vmem [shape: f32[1,60], index: 3, kind: input, shape index: {}]   ;;  %s2113_s4 = inlined_call_operand.vmem [shape: bf16[60,10], index: 4, kind: input, shape index: {}]   ;;  %s2114_s5 = inlined_call_operand.vmem [shape: f32[1,10], index: 5, kind: input, shape index: {}]   ;;  %s2115_s6 = inlined_call_operand.vmem [shape: bf16[8,10], index: 6, kind: input, shape index: {}]   ;;  %s2116_s7 = inlined_call_operand.<no memory space> [shape: f32[1,1], index: 7, kind: input, shape index: {}]   ;;  %s2117_s8 = inlined_call_operand.hbm [shape: f32[1,512], index: 8, kind: output, shape index: {}]  }
   0x1   :  { %v13_v0 = vstv %s2116_s7 }
   0x2   :  { %14 = vst [vmem:[#allocation2] sm:$0x1] %v13_v0 }
   0x3   :  { %15 = vsyncpa [#allocation4], 0 }
   0x4   :  { %17 = vsyncpa [#allocation4 + $0x1], 0  ;;  %s1717_s29 = smov 0   ;;  %s1719_s30 = smov 0  }
   0x5   :  { %s1721_s9 = smov 0   ;;  %s1723_s10 = smov 0  }
   0x6 LB: > { %s1333_s7 = sadd.s32 4294967295, %s1663_s10   ;;  %s1334_s11 = sadd.s32 4294967294, %s1663_s10   ;;  %s1663_s10 = sphi %s1723_s10, %s2123_s10   ;;  %s1659_s9 = sphi %s1721_s9, %s2122_s9   ;;  %s1655_s30 = sphi %s1719_s30, %s2121_s30   ;;  %s1651_s29 = sphi %s1717_s29, %s2120_s29  }
   0x7   : > { %s1740_s12 = sadd.s32 1, %s1663_s10   ;;  %s208_s13 = sadd.s32 1, %s1659_s9 }
   0x8   : > { %s205_s14 = ssub.s32 %s1663_s10, %s1740_s12  ;;  %p218_p0 = scmp.ne.s32.totalorder %s1659_s9, %s1655_s30 }
   0x9   : > { %p206_p1 = scmp.eq.s32.totalorder %s205_s14, 0  ;;  %p219_p2 = scmp.eq.s32.totalorder %s1333_s7, 1 }
   0xa   : > { %p224_p3 = scmp.ne.s32.totalorder %s1655_s30, %s1651_s29  ;;  %p225_p4 = scmp.eq.s32.totalorder %s1334_s11, 1 }
   0xb   : > { %s1750_s15 = scalar_select %p206_p1, %s1659_s9, %s208_s13  }
   0xc   : > { %p1752_p5 = por %p219_p2, %p218_p0  ;;  %p1756_p6 = por %p225_p4, %p224_p3 }
   0xd   : > { %p1337_p7 = scmp.ge.s32.totalorder %s1663_s10, 1  ;;  %p279_p8 = scmp.lt.s32.totalorder %s1663_s10, 3 }
   0xf   : > { %p280_p9 = pnand %p1337_p7, %p279_p8 }
  0x10   : > { %s1762_s18 = sshll.u32 (!%p280_p9), %s1333_s7, 5  ;;  %v1585_v1 = vld [vmem:[%s2111_s2] sm:$0xff] (!%p280_p9)   ;;  %v1586_v2 = vld [vmem:[%s2111_s2 + $0x8] sm:$0xff] (!%p280_p9)   ;;  %v1587_v3 = vld [vmem:[%s2111_s2 + $0x10] sm:$0xff] (!%p280_p9)   ;;  %s1665_s14 = smov (!%p280_p9), 30   ;;  %vm596_vm0 = vcmask (!%p280_p9), 1045504  }
  0x11   : > { %283 = sbr.rel (%p280_p9) target bundleno = 951 (0x3b7), region = 52  ;;  %p319_p10 = scmp.lt.s32.totalorder (!%p280_p9), %s1762_s18, 63  ;;  %1452 = vmatprep.subr.bf16.mxu0 (!%p280_p9), %v1585_v1  ;;  %v1588_v14 = vld [vmem:[%s2111_s2 + $0x18] sm:$0x3f] (!%p280_p9)   ;;  %v1589_v54 = vld [vmem:[%s2113_s4] sm:$0xff] (!%p280_p9)   ;;  %v1590_v55 = vld [vmem:[%s2113_s4 + $0x8] sm:$0xff] (!%p280_p9)  }
  0x12   : > { %1453 = vmatpush3.bf16.msra.mxu0 (!%p280_p9), %v1585_v1  ;;  %v598_v21 = vsel (!%p280_p9), %vm596_vm0, %v1588_v14, 0  ;;  %1492 = vmatprep.subr.bf16.mxu1 (!%p280_p9), %v1589_v54  ;;  %vm476_vm1 = vcmask (!%p280_p9), 244736   ;;  %vm563_vm2 = vcmask (!%p280_p9), 490496   ;;  %vm1108_vm3 = vcmask (!%p280_p9), 80896   ;;  %s315_s22 = sand.u32 (!%p280_p9), 1, %s1655_s30   ;;  %s2067_s28 = scalar_lea.hbm (!%p280_p9), %s2117_s8, %s1762_s18 }
  0x13   : > { %1454 = vmatprep.subr.bf16.mxu0 (!%p280_p9), %v1586_v2  ;;  %1493 = vmatpush3.bf16.msra.mxu1 (!%p280_p9), %v1589_v54  ;;  %s1338_s25 = sshll.u32 (!%p280_p9), %s315_s22, 1  ;;  %s1668_s13 = smov (!%p280_p9), [#allocation3]  }
  0x14   : > { %1494 = vmatprep.subr.bf16.mxu1 (!%p280_p9), %v1590_v55  ;;  %s317_s26 = scalar_lea.vmem (!%p280_p9), [#allocation3], %s1338_s25 }
  0x16   : > { %1455 = vmatpush3.bf16.msra.mxu0 (!%p280_p9), %v1586_v2 }
  0x17   : > { %1456 = vmatprep.subr.bf16.mxu0 (!%p280_p9), %v1587_v3  ;;  %1495 = vmatpush3.bf16.msra.mxu1 (!%p280_p9), %v1590_v55 }
  0x18   : > { %s1772_s23 = scalar_select %p319_p10, %s1762_s18, 63 }
  0x1a   : > { %s1340_s24 = sshll.u32 %s1772_s23, 3  ;;  %1457 = vmatpush3.bf16.msra.mxu0 %v1587_v3 }
  0x1b   : > { %s1783_s7 = scalar_lea.vmem %s2110_s1, %s1340_s24  ;;  %1532 = vmatprep.subr.msk.bf16.mxu0 %vm596_vm0, %v1588_v14  ;;  %s1849_s27 = scalar_lea.vmem %s2109_s0, %s1340_s24 }
  0x1c   : > { %v380_v4 = vld [vmem:[%s1783_s7] sm:$0xff]  ;;  %v381_v5 = vld [vmem:[%s1783_s7 + $0x8] sm:$0xff]  ;;  %v382_v6 = vld [vmem:[%s1783_s7 + $0x10] sm:$0xff] }
  0x1d   : > { %v412_v7 = vpack.c.bf16 %v381_v5, %v380_v4  ;;  %v383_v8 = vld [vmem:[%s1783_s7 + $0x18] sm:$0xff]  ;;  %v384_v9 = vld [vmem:[%s1783_s7 + $0x20] sm:$0xff]  ;;  %v385_v10 = vld [vmem:[%s1783_s7 + $0x28] sm:$0xff] }
  0x1e   : > { %v414_v11 = vpack.c.bf16 %v385_v10, %v384_v9  ;;  %v386_v12 = vld [vmem:[%s1783_s7 + $0x30] sm:$0xff]  ;;  %v387_v13 = vld [vmem:[%s1783_s7 + $0x38] sm:$0xff]  ;;  %v413_v15 = vpack.c.bf16 %v383_v8, %v382_v6  ;;  %v388_v17 = vld [vmem:[%s1783_s7 + $0x40] sm:$0xff]  ;;  %1459 = vmatpush3.bf16.msra.mxu0 %v598_v21 }
  0x1f   : > { %444 = vrot.lane.b32.xlu0 %v412_v7, %s1665_s14  ;;  %v415_v16 = vpack.c.bf16 %v387_v13, %v386_v12  ;;  %v389_v18 = vld [vmem:[%s1783_s7 + $0x48] sm:$0xff]  ;;  %v390_v19 = vld [vmem:[%s1783_s7 + $0x50] sm:$0xff]  ;;  %v391_v20 = vld [vmem:[%s1783_s7 + $0x58] sm:$0xff] }
  0x20   : > { %448 = vrot.lane.b32.xlu1 %v414_v11, %s1665_s14  ;;  %v416_v22 = vpack.c.bf16 %v389_v18, %v388_v17  ;;  %v417_v23 = vpack.c.bf16 %v391_v20, %v390_v19  ;;  %v392_v24 = vld [vmem:[%s1783_s7 + $0x60] sm:$0xff]  ;;  %v393_v25 = vld [vmem:[%s1783_s7 + $0x68] sm:$0xff]  ;;  %v394_v26 = vld [vmem:[%s1783_s7 + $0x70] sm:$0xff] }
  0x21   : > { %v395_v27 = vld [vmem:[%s1783_s7 + $0x78] sm:$0xff]  ;;  %v418_v28 = vpack.c.bf16 %v393_v25, %v392_v24  ;;  %v396_v30 = vld [vmem:[%s1783_s7 + $0x80] sm:$0xff]  ;;  %v397_v31 = vld [vmem:[%s1783_s7 + $0x88] sm:$0xff] }
  0x22   : > { %v419_v29 = vpack.c.bf16 %v395_v27, %v394_v26  ;;  %v398_v32 = vld [vmem:[%s1783_s7 + $0x90] sm:$0xff]  ;;  %v399_v33 = vld [vmem:[%s1783_s7 + $0x98] sm:$0xff]  ;;  %v420_v34 = vpack.c.bf16 %v397_v31, %v396_v30  ;;  %v400_v35 = vld [vmem:[%s1783_s7 + $0xa0] sm:$0xff] }
  0x23   : > { %446 = vrot.lane.b32.xlu0 %v413_v15, %s1665_s14  ;;  %v401_v36 = vld [vmem:[%s1783_s7 + $0xa8] sm:$0xff]  ;;  %v421_v37 = vpack.c.bf16 %v399_v33, %v398_v32  ;;  %v402_v38 = vld [vmem:[%s1783_s7 + $0xb0] sm:$0xff]  ;;  %v403_v39 = vld [vmem:[%s1783_s7 + $0xb8] sm:$0xff] }
  0x24   : > { %450 = vrot.lane.b32.xlu1 %v415_v16, %s1665_s14  ;;  %v422_v40 = vpack.c.bf16 %v401_v36, %v400_v35  ;;  %v423_v41 = vpack.c.bf16 %v403_v39, %v402_v38  ;;  %v404_v42 = vld [vmem:[%s1783_s7 + $0xc0] sm:$0xff]  ;;  %v405_v43 = vld [vmem:[%s1783_s7 + $0xc8] sm:$0xff]  ;;  %v406_v44 = vld [vmem:[%s1783_s7 + $0xd0] sm:$0xff] }
  0x25   : > { %v407_v45 = vld [vmem:[%s1783_s7 + $0xd8] sm:$0xff]  ;;  %v424_v46 = vpack.c.bf16 %v405_v43, %v404_v42  ;;  %v408_v48 = vld [vmem:[%s1783_s7 + $0xe0] sm:$0xff]  ;;  %v409_v49 = vld [vmem:[%s1783_s7 + $0xe8] sm:$0xff] }
  0x26   : > { %v425_v47 = vpack.c.bf16 %v407_v45, %v406_v44  ;;  %v410_v50 = vld [vmem:[%s1783_s7 + $0xf0] sm:$0xff]  ;;  %v411_v51 = vld [vmem:[%s1783_s7 + $0xf8] sm:$0xff]  ;;  %v426_v52 = vpack.c.bf16 %v409_v49, %v408_v48  ;;  %v332_v56 = vld [vmem:[%s1849_s27] sm:$0xff]  ;;  %s1249_s7 = scalar_lea.sflag [#allocation4], %s315_s22 }
  0x27   : > { %452 = vrot.lane.b32.xlu0 %v416_v22, %s1665_s14  ;;  %v427_v53 = vpack.c.bf16 %v411_v51, %v410_v50  ;;  %v333_v57 = vld [vmem:[%s1849_s27 + $0x8] sm:$0xff]  ;;  %v336_v59 = vld [vmem:[%s1849_s27 + $0x20] sm:$0xff]  ;;  %v334_v61 = vld [vmem:[%s1849_s27 + $0x10] sm:$0xff] }
  0x28   : > { %454 = vrot.lane.b32.xlu1 %v417_v23, %s1665_s14  ;;  %v364_v58 = vpack.c.bf16 %v333_v57, %v332_v56  ;;  %v337_v60 = vld [vmem:[%s1849_s27 + $0x28] sm:$0xff]  ;;  %v335_v62 = vld [vmem:[%s1849_s27 + $0x18] sm:$0xff]  ;;  %v338_v6 = vld [vmem:[%s1849_s27 + $0x30] sm:$0xff] }
  0x29   : > { %v366_v0 = vpack.c.bf16 %v337_v60, %v336_v59  ;;  %v365_v2 = vpack.c.bf16 %v335_v62, %v334_v61  ;;  %v339_v7 = vld [vmem:[%s1849_s27 + $0x38] sm:$0xff]  ;;  %v340_v9 = vld [vmem:[%s1849_s27 + $0x40] sm:$0xff]  ;;  %v341_v10 = vld [vmem:[%s1849_s27 + $0x48] sm:$0xff] }
  0x2a   : > { %v367_v11 = vpack.c.bf16 %v339_v7, %v338_v6  ;;  %v368_v13 = vpack.c.bf16 %v341_v10, %v340_v9  ;;  %v342_v17 = vld [vmem:[%s1849_s27 + $0x50] sm:$0xff]  ;;  %v343_v18 = vld [vmem:[%s1849_s27 + $0x58] sm:$0xff]  ;;  %v344_v19 = vld [vmem:[%s1849_s27 + $0x60] sm:$0xff] }
  0x2b   : > { %456 = vrot.lane.b32.xlu0 %v418_v28, %s1665_s14  ;;  %v345_v20 = vld [vmem:[%s1849_s27 + $0x68] sm:$0xff]  ;;  %v369_v21 = vpack.c.bf16 %v343_v18, %v342_v17  ;;  %v346_v27 = vld [vmem:[%s1849_s27 + $0x70] sm:$0xff]  ;;  %v347_v28 = vld [vmem:[%s1849_s27 + $0x78] sm:$0xff] }
  0x2c   : > { %458 = vrot.lane.b32.xlu1 %v419_v29, %s1665_s14  ;;  %v370_v23 = vpack.c.bf16 %v345_v20, %v344_v19  ;;  %v348_v29 = vld [vmem:[%s1849_s27 + $0x80] sm:$0xff]  ;;  %v349_v30 = vld [vmem:[%s1849_s27 + $0x88] sm:$0xff]  ;;  %v371_v31 = vpack.c.bf16 %v347_v28, %v346_v27  ;;  %v351_v38 = vld [vmem:[%s1849_s27 + $0x98] sm:$0xff] }
  0x2d   : > { %v372_v33 = vpack.c.bf16 %v349_v30, %v348_v29  ;;  %v352_v39 = vld [vmem:[%s1849_s27 + $0xa0] sm:$0xff]  ;;  %v355_v48 = vld [vmem:[%s1849_s27 + $0xb8] sm:$0xff]  ;;  %v357_v50 = vld [vmem:[%s1849_s27 + $0xc8] sm:$0xff] }
  0x2e   : > { %v356_v49 = vld [vmem:[%s1849_s27 + $0xc0] sm:$0xff]  ;;  %v358_v57 = vld [vmem:[%s1849_s27 + $0xd0] sm:$0xff]  ;;  %v361_v60 = vld [vmem:[%s1849_s27 + $0xe8] sm:$0xff] }
  0x2f   : > { %460 = vrot.lane.b32.xlu0 %v420_v34, %s1665_s14  ;;  %v360_v59 = vld [vmem:[%s1849_s27 + $0xe0] sm:$0xff]  ;;  %v1592_v9 = vld [vmem:[%s2113_s4 + $0x18] sm:$0x3f]  }
  0x30   : > { %462 = vrot.lane.b32.xlu1 %v421_v37, %s1665_s14  ;;  %v350_v37 = vld [vmem:[%s1849_s27 + $0x90] sm:$0xff]  ;;  %v896_v10 = vsel %vm596_vm0, %v1592_v9, 0 }
  0x33   : > { %464 = vrot.lane.b32.xlu0 %v422_v40, %s1665_s14  ;;  %v353_v40 = vld [vmem:[%s1849_s27 + $0xa8] sm:$0xff] }
  0x34   : > { %466 = vrot.lane.b32.xlu1 %v423_v41, %s1665_s14  ;;  %v373_v41 = vpack.c.bf16 %v351_v38, %v350_v37  ;;  %v374_v43 = vpack.c.bf16 %v353_v40, %v352_v39 }
  0x37   : > { %468 = vrot.lane.b32.xlu0 %v424_v46, %s1665_s14 }
  0x38   : > { %470 = vrot.lane.b32.xlu1 %v425_v47, %s1665_s14  ;;  %v354_v47 = vld [vmem:[%s1849_s27 + $0xb0] sm:$0xff] }
  0x39   : > { %v375_v51 = vpack.c.bf16 %v355_v48, %v354_v47 }
  0x3b   : > { %472 = vrot.lane.b32.xlu0 %v426_v52, %s1665_s14 }
  0x3c   : > { %474 = vrot.lane.b32.xlu1 %v427_v53, %s1665_s14  ;;  %v376_v53 = vpack.c.bf16 %v357_v50, %v356_v49  ;;  %s1605_s14 = sshll.u32 %s1668_s13, 4  ;;  %s1606_s14 = int_to_ptr.vmem [resolvable:$false] %s1605_s14 }
  0x3d   : > { %s1607_s19 = scalar_lea.vmem %s1606_s14, 64 }
  0x91   : > { %v445_v63 = vpop.permute.xlu0 %444 }
  0x92   : > { %v479_v1 = vsel %vm476_vm1, %v364_v58, %v445_v63  ;;  %v449_v3 = vpop.permute.xlu1 %448  ;;  %v359_v58 = vld [vmem:[%s1849_s27 + $0xd8] sm:$0xff]  ;;  %v378_v63 = vpack.c.bf16 %v361_v60, %v360_v59 }
  0x93   : > { %1460 = vmatprep.mubr.msk.bf16.mxu0 %vm563_vm2, %v479_v1  ;;  %v485_v5 = vsel %vm476_vm1, %v366_v0, %v449_v3  ;;  %v377_v61 = vpack.c.bf16 %v359_v58, %v358_v57  ;;  %v362_v3 = vld [vmem:[%s1849_s27 + $0xf0] sm:$0xff] }
  0x95   : > { %v447_v4 = vpop.permute.xlu0 %446 }
  0x96   : > { %v482_v8 = vsel %vm476_vm1, %v365_v2, %v447_v4  ;;  %v451_v12 = vpop.permute.xlu1 %450  ;;  %v363_v4 = vld [vmem:[%s1849_s27 + $0xf8] sm:$0xff]  ;;  %s1263_s27 = sshll.u32 %s317_s26, 4  ;;  %s2069_s27 = int_to_ptr.vmem [resolvable:$true] %s1263_s27 }
  0x97   : > { %1461 = vmatmul.mubr.msk.bf16.vlgmr.msra.gmra.mrb[0].mxu0 %vm563_vm2, %v482_v8  ;;  %v488_v15 = vsel %vm476_vm1, %v367_v11, %v451_v12  ;;  %v1591_v8 = vld [vmem:[%s2113_s4 + $0x10] sm:$0xff]   ;;  %v1926_v11 = vld [vmem:[%s2112_s3] ss:$0 sm:$0xff]  ;;  %s1601_s11 = scalar_lea.vmem %s2069_s27, 32  ;;  %p1608_p0 = scmp.lt.s32.totalorder %s2069_s27, %s1606_s14 }
  0x98   : > { %1464 = vmatprep.mubr.msk.bf16.mxu0 %vm563_vm2, %v485_v5  ;;  %v379_v5 = vpack.c.bf16 %v363_v4, %v362_v3  ;;  %1496 = vmatprep.subr.bf16.mxu1 %v1591_v8  ;;  %p1602_p11 = scmp.ne.s32.totalorder %s2069_s27, %s1601_s11  ;;  %p1609_p1 = scmp.lt.s32.totalorder %s1607_s19, %s1601_s11 }
  0x99   : > { %v453_v14 = vpop.permute.xlu0 %452  ;;  %1497 = vmatpush3.bf16.msra.mxu1 %v1591_v8 }
  0x9a   : > { %v491_v16 = vsel %vm476_vm1, %v368_v13, %v453_v14  ;;  %v455_v22 = vpop.permute.xlu1 %454  ;;  %1533 = vmatprep.subr.msk.bf16.mxu1 %vm596_vm0, %v1592_v9  ;;  %p1603_p12 = pnand %p1602_p11, %p1752_p5  ;;  %p1610_p2 = por %p1609_p1, %p1608_p0 }
  0x9b   : > { %v494_v25 = vsel %vm476_vm1, %v369_v21, %v455_v22 }
  0x9c   : > { %p1604_p13 = pneg %p1603_p12 }
  0x9d   : > { %v457_v24 = vpop.permute.xlu0 %456  ;;  %1499 = vmatpush3.bf16.msra.mxu1 %v896_v10 }
  0x9e   : > { %v497_v26 = vsel %vm476_vm1, %v370_v23, %v457_v24  ;;  %v459_v32 = vpop.permute.xlu1 %458  ;;  %p1611_p3 = pnand %p1610_p2, %p1604_p13 }
  0x9f   : > { %1465 = vmatmul.mubr.msk.bf16.gmra.mrb[4].mxu0 %vm563_vm2, %v488_v15  ;;  %v500_v35 = vsel %vm476_vm1, %v371_v31, %v459_v32 }
  0xa0   : > { %1468 = vmatprep.mubr.msk.bf16.mxu0 %vm563_vm2, %v491_v16 }
  0xa1   : > { %v461_v34 = vpop.permute.xlu0 %460 }
  0xa2   : > { %v503_v36 = vsel %vm476_vm1, %v372_v33, %v461_v34  ;;  %v463_v42 = vpop.permute.xlu1 %462 }
  0xa3   : > { %v506_v45 = vsel %vm476_vm1, %v373_v41, %v463_v42 }
  0xa5   : > { %v465_v44 = vpop.permute.xlu0 %464 }
  0xa6   : > { %v509_v46 = vsel %vm476_vm1, %v374_v43, %v465_v44  ;;  %v467_v52 = vpop.permute.xlu1 %466 }
  0xa7   : > { %1469 = vmatmul.mubr.msk.bf16.gmra.mrb[8].mxu0 %vm563_vm2, %v494_v25  ;;  %v512_v55 = vsel %vm476_vm1, %v375_v51, %v467_v52 }
  0xa8   : > { %1472 = vmatprep.mubr.msk.bf16.mxu0 %vm563_vm2, %v497_v26 }
  0xa9   : > { %v469_v54 = vpop.permute.xlu0 %468 }
  0xaa   : > { %v515_v56 = vsel %vm476_vm1, %v376_v53, %v469_v54  ;;  %v471_v62 = vpop.permute.xlu1 %470 }
  0xab   : > { %v518_v1 = vsel %vm476_vm1, %v377_v61, %v471_v62 }
  0xad   : > { %v473_v0 = vpop.permute.xlu0 %472 }
  0xae   : > { %v521_v2 = vsel %vm476_vm1, %v378_v63, %v473_v0  ;;  %v475_v6 = vpop.permute.xlu1 %474 }
  0xaf   : > { %1473 = vmatmul.mubr.msk.bf16.gmra.mrb[12].mxu0 %vm563_vm2, %v500_v35  ;;  %v524_v7 = vsel %vm476_vm1, %v379_v5, %v475_v6 }
  0xb0   : > { %1476 = vmatprep.mubr.msk.bf16.mxu0 %vm563_vm2, %v503_v36 }
  0xb7   : > { %1477 = vmatmul.mubr.msk.bf16.gmra.mrb[16].mxu0 %vm563_vm2, %v506_v45 }
  0xb8   : > { %1480 = vmatprep.mubr.msk.bf16.mxu0 %vm563_vm2, %v509_v46 }
  0xbf   : > { %1481 = vmatmul.mubr.msk.bf16.gmra.mrb[20].mxu0 %vm563_vm2, %v512_v55 }
  0xc0   : > { %1484 = vmatprep.mubr.msk.bf16.mxu0 %vm563_vm2, %v515_v56 }
  0xc7   : > { %1485 = vmatmul.mubr.msk.bf16.gmra.mrb[24].mxu0 %vm563_vm2, %v518_v1 }
  0xc8   : > { %1488 = vmatprep.mubr.msk.bf16.mxu0 %vm563_vm2, %v521_v2 }
  0xcf   : > { %1489 = vmatmul.mubr.msk.bf16.gmra.mrb[28].mxu0 %vm563_vm2, %v524_v7 }
 0x16a   : > { %v1462_v12 = vpop.f32.mrb[0].mxu0 }
 0x16b   : > { %v643_v13 = vadd.f32 %v1462_v12, %v1926_v11  ;;  %v634_v14 = vpop.f32.mrb[1].mxu0 }
 0x16c   : > { %v635_v15 = vadd.f32 %v1926_v11, %v634_v14  ;;  %v1463_v16 = vpop.f32.mrb[2].mxu0 }
 0x16d   : > { %v646_v17 = vadd.f32 %v1463_v16, %v1926_v11  ;;  %v637_v18 = vpop.f32.mrb[3].mxu0  ;;  %v763_v20 = vmax.f32 %v643_v13, 0.0 }
 0x16e   : > { %v638_v19 = vadd.f32 %v1926_v11, %v637_v18  ;;  %v761_v22 = vmax.f32 %v635_v15, 0.0 }
 0x16f   : > { %v764_v21 = vmax.f32 %v646_v17, 0.0 }
 0x170   : > { %v762_v23 = vmax.f32 %v638_v19, 0.0 }
 0x171   : > { %v794_v24 = vpack.c.bf16 %v764_v21, %v763_v20 }
 0x172   : > { %v1466_v25 = vpop.f32.mrb[4].mxu0  ;;  %v793_v26 = vpack.c.bf16 %v762_v23, %v761_v22 }
 0x173   : > { %v659_v27 = vadd.f32 %v1466_v25, %v1926_v11  ;;  %v650_v28 = vpop.f32.mrb[5].mxu0 }
 0x174   : > { %v651_v29 = vadd.f32 %v1926_v11, %v650_v28  ;;  %v1467_v30 = vpop.f32.mrb[6].mxu0  ;;  %1500 = vmatprep.mubr.msk.bf16.mxu1 %vm563_vm2, %v793_v26 }
 0x175   : > { %v662_v31 = vadd.f32 %v1467_v30, %v1926_v11  ;;  %v653_v32 = vpop.f32.mrb[7].mxu0  ;;  %1501 = vmatmul.mubr.msk.bf16.vlgmr.msra.gmra.mrb[0].mxu1 %vm563_vm2, %v794_v24  ;;  %v767_v34 = vmax.f32 %v659_v27, 0.0 }
 0x176   : > { %v654_v33 = vadd.f32 %v1926_v11, %v653_v32  ;;  %v765_v36 = vmax.f32 %v651_v29, 0.0 }
 0x177   : > { %v768_v35 = vmax.f32 %v662_v31, 0.0 }
 0x178   : > { %v766_v37 = vmax.f32 %v654_v33, 0.0 }
 0x179   : > { %v796_v38 = vpack.c.bf16 %v768_v35, %v767_v34 }
 0x17a   : > { %v795_v39 = vpack.c.bf16 %v766_v37, %v765_v36  ;;  %v1470_v40 = vpop.f32.mrb[8].mxu0 }
 0x17b   : > { %v675_v41 = vadd.f32 %v1470_v40, %v1926_v11  ;;  %v666_v42 = vpop.f32.mrb[9].mxu0 }
 0x17c   : > { %v667_v43 = vadd.f32 %v1926_v11, %v666_v42  ;;  %v1471_v44 = vpop.f32.mrb[10].mxu0  ;;  %1504 = vmatprep.mubr.msk.bf16.mxu1 %vm563_vm2, %v795_v39 }
 0x17d   : > { %v678_v45 = vadd.f32 %v1471_v44, %v1926_v11  ;;  %v669_v46 = vpop.f32.mrb[11].mxu0  ;;  %1505 = vmatmul.mubr.msk.bf16.gmra.mrb[4].mxu1 %vm563_vm2, %v796_v38  ;;  %v771_v48 = vmax.f32 %v675_v41, 0.0 }
 0x17e   : > { %v670_v47 = vadd.f32 %v1926_v11, %v669_v46  ;;  %v769_v50 = vmax.f32 %v667_v43, 0.0 }
 0x17f   : > { %v772_v49 = vmax.f32 %v678_v45, 0.0 }
 0x180   : > { %v770_v51 = vmax.f32 %v670_v47, 0.0 }
 0x181   : > { %v798_v52 = vpack.c.bf16 %v772_v49, %v771_v48 }
 0x182   : > { %v797_v53 = vpack.c.bf16 %v770_v51, %v769_v50  ;;  %v1474_v54 = vpop.f32.mrb[12].mxu0 }
 0x183   : > { %v691_v55 = vadd.f32 %v1474_v54, %v1926_v11  ;;  %v682_v56 = vpop.f32.mrb[13].mxu0 }
 0x184   : > { %v683_v57 = vadd.f32 %v1926_v11, %v682_v56  ;;  %v1475_v58 = vpop.f32.mrb[14].mxu0  ;;  %1508 = vmatprep.mubr.msk.bf16.mxu1 %vm563_vm2, %v797_v53 }
 0x185   : > { %v694_v59 = vadd.f32 %v1475_v58, %v1926_v11  ;;  %v685_v60 = vpop.f32.mrb[15].mxu0  ;;  %1509 = vmatmul.mubr.msk.bf16.gmra.mrb[8].mxu1 %vm563_vm2, %v798_v52  ;;  %v775_v62 = vmax.f32 %v691_v55, 0.0 }
 0x186   : > { %v686_v61 = vadd.f32 %v1926_v11, %v685_v60  ;;  %v773_v0 = vmax.f32 %v683_v57, 0.0 }
 0x187   : > { %v776_v63 = vmax.f32 %v694_v59, 0.0 }
 0x188   : > { %v774_v1 = vmax.f32 %v686_v61, 0.0  ;;  %v1979_v61 = vld [vmem:[%s2115_s6] sm:$0xf] }
 0x189   : > { %v800_v2 = vpack.c.bf16 %v776_v63, %v775_v62  ;;  %1450 = vmatprep.mubr.msk.bf16.mxu0 %vm1108_vm3, %v1979_v61  ;;  %v1201_v62 = vld [vmem:[#allocation2] sm:$0x1]  ;;  %v1666_v63 = vmov 0  }
 0x18a   : > { %v799_v3 = vpack.c.bf16 %v774_v1, %v773_v0  ;;  %v1478_v4 = vpop.f32.mrb[16].mxu0  ;;  %1584 = vset.pattern.permute.xlu0 %v1666_v63 }
 0x18b   : > { %v707_v5 = vadd.f32 %v1478_v4, %v1926_v11  ;;  %v698_v6 = vpop.f32.mrb[17].mxu0  ;;  %1204 = vperm.xlu0 %1584, %v1201_v62  }
 0x18c   : > { %v699_v7 = vadd.f32 %v1926_v11, %v698_v6  ;;  %v1479_v8 = vpop.f32.mrb[18].mxu0  ;;  %1512 = vmatprep.mubr.msk.bf16.mxu1 %vm563_vm2, %v799_v3 }
 0x18d   : > { %v710_v9 = vadd.f32 %v1479_v8, %v1926_v11  ;;  %v701_v10 = vpop.f32.mrb[19].mxu0  ;;  %1513 = vmatmul.mubr.msk.bf16.gmra.mrb[12].mxu1 %vm563_vm2, %v800_v2  ;;  %v779_v13 = vmax.f32 %v707_v5, 0.0 }
 0x18e   : > { %v702_v12 = vadd.f32 %v1926_v11, %v701_v10  ;;  %v777_v15 = vmax.f32 %v699_v7, 0.0 }
 0x18f   : > { %v780_v14 = vmax.f32 %v710_v9, 0.0 }
 0x190   : > { %v778_v16 = vmax.f32 %v702_v12, 0.0 }
 0x191   : > { %v802_v17 = vpack.c.bf16 %v780_v14, %v779_v13 }
 0x192   : > { %v801_v18 = vpack.c.bf16 %v778_v16, %v777_v15  ;;  %v1482_v19 = vpop.f32.mrb[20].mxu0 }
 0x193   : > { %v723_v20 = vadd.f32 %v1482_v19, %v1926_v11  ;;  %v714_v21 = vpop.f32.mrb[21].mxu0 }
 0x194   : > { %v715_v22 = vadd.f32 %v1926_v11, %v714_v21  ;;  %1516 = vmatprep.mubr.msk.bf16.mxu1 %vm563_vm2, %v801_v18  ;;  %v1483_v23 = vpop.f32.mrb[22].mxu0 }
 0x195   : > { %v783_v24 = vmax.f32 %v723_v20, 0.0  ;;  %v726_v25 = vadd.f32 %v1483_v23, %v1926_v11  ;;  %1517 = vmatmul.mubr.msk.bf16.gmra.mrb[16].mxu1 %vm563_vm2, %v802_v17  ;;  %v717_v26 = vpop.f32.mrb[23].mxu0 }
 0x196   : > { %v781_v27 = vmax.f32 %v715_v22, 0.0  ;;  %v718_v28 = vadd.f32 %v1926_v11, %v717_v26 }
 0x197   : > { %v784_v29 = vmax.f32 %v726_v25, 0.0 }
 0x198   : > { %v782_v30 = vmax.f32 %v718_v28, 0.0 }
 0x199   : > { %v804_v31 = vpack.c.bf16 %v784_v29, %v783_v24 }
 0x19a   : > { %v803_v32 = vpack.c.bf16 %v782_v30, %v781_v27  ;;  %v1486_v33 = vpop.f32.mrb[24].mxu0 }
 0x19b   : > { %v739_v34 = vadd.f32 %v1486_v33, %v1926_v11  ;;  %v730_v35 = vpop.f32.mrb[25].mxu0 }
 0x19c   : > { %1520 = vmatprep.mubr.msk.bf16.mxu1 %vm563_vm2, %v803_v32  ;;  %v731_v36 = vadd.f32 %v1926_v11, %v730_v35  ;;  %v1487_v37 = vpop.f32.mrb[26].mxu0 }
 0x19d   : > { %1521 = vmatmul.mubr.msk.bf16.gmra.mrb[20].mxu1 %vm563_vm2, %v804_v31  ;;  %v787_v38 = vmax.f32 %v739_v34, 0.0  ;;  %v742_v39 = vadd.f32 %v1487_v37, %v1926_v11  ;;  %v733_v40 = vpop.f32.mrb[27].mxu0 }
 0x19e   : > { %v785_v41 = vmax.f32 %v731_v36, 0.0  ;;  %v734_v42 = vadd.f32 %v1926_v11, %v733_v40 }
 0x19f   : > { %v788_v43 = vmax.f32 %v742_v39, 0.0 }
 0x1a0   : > { %v786_v44 = vmax.f32 %v734_v42, 0.0 }
 0x1a1   : > { %v806_v45 = vpack.c.bf16 %v788_v43, %v787_v38 }
 0x1a2   : > { %v805_v46 = vpack.c.bf16 %v786_v44, %v785_v41  ;;  %v1490_v47 = vpop.f32.mrb[28].mxu0 }
 0x1a3   : > { %v755_v48 = vadd.f32 %v1490_v47, %v1926_v11  ;;  %v746_v49 = vpop.f32.mrb[29].mxu0 }
 0x1a4   : > { %1524 = vmatprep.mubr.msk.bf16.mxu1 %vm563_vm2, %v805_v46  ;;  %v747_v50 = vadd.f32 %v1926_v11, %v746_v49  ;;  %v1491_v51 = vpop.f32.mrb[30].mxu0 }
 0x1a5   : > { %1525 = vmatmul.mubr.msk.bf16.gmra.mrb[24].mxu1 %vm563_vm2, %v806_v45  ;;  %v791_v52 = vmax.f32 %v755_v48, 0.0  ;;  %v758_v53 = vadd.f32 %v1491_v51, %v1926_v11  ;;  %v749_v54 = vpop.f32.mrb[31].mxu0 }
 0x1a6   : > { %v789_v55 = vmax.f32 %v747_v50, 0.0  ;;  %v750_v56 = vadd.f32 %v1926_v11, %v749_v54  ;;  %v1986_v11 = vld [vmem:[%s2114_s5] ss:$0 sm:$0xff] }
 0x1a7   : > { %v792_v57 = vmax.f32 %v758_v53, 0.0 }
 0x1a8   : > { %v790_v58 = vmax.f32 %v750_v56, 0.0 }
 0x1a9   : > { %v808_v59 = vpack.c.bf16 %v792_v57, %v791_v52 }
 0x1aa   : > { %v807_v60 = vpack.c.bf16 %v790_v58, %v789_v55 }
 0x1ac   : > { %1528 = vmatprep.mubr.msk.bf16.mxu1 %vm563_vm2, %v807_v60 }
 0x1ad   : > { %1529 = vmatmul.mubr.msk.bf16.gmra.mrb[28].mxu1 %vm563_vm2, %v808_v59 }
 0x248   : > { %v1502_v0 = vpop.f32.mrb[0].mxu1 }
 0x249   : > { %v941_v1 = vadd.f32 %v1502_v0, %v1986_v11  ;;  %v932_v2 = vpop.f32.mrb[1].mxu1 }
 0x24a   : > { %v933_v3 = vadd.f32 %v1986_v11, %v932_v2  ;;  %v1503_v4 = vpop.f32.mrb[2].mxu1 }
 0x24b   : > { %v944_v5 = vadd.f32 %v1503_v4, %v1986_v11  ;;  %v935_v6 = vpop.f32.mrb[3].mxu1  ;;  %v1061_v8 = vmax.f32 %v941_v1, 0.0 }
 0x24c   : > { %v936_v7 = vadd.f32 %v1986_v11, %v935_v6  ;;  %v1059_v10 = vmax.f32 %v933_v3, 0.0 }
 0x24d   : > { %v1062_v9 = vmax.f32 %v944_v5, 0.0 }
 0x24e   : > { %v1060_v12 = vmax.f32 %v936_v7, 0.0 }
 0x24f   : > { %v1992_v13 = vpack.c.bf16 %v1062_v9, %v1061_v8 }
 0x250   : > { %v1994_v14 = vpack.c.bf16 %v1060_v12, %v1059_v10  ;;  %v1506_v15 = vpop.f32.mrb[4].mxu1 }
 0x251   : > { %v957_v16 = vadd.f32 %v1506_v15, %v1986_v11  ;;  %v948_v17 = vpop.f32.mrb[5].mxu1 }
 0x252   : > { %v949_v18 = vadd.f32 %v1986_v11, %v948_v17  ;;  %v1507_v19 = vpop.f32.mrb[6].mxu1 }
 0x253   : > { %v960_v20 = vadd.f32 %v1507_v19, %v1986_v11  ;;  %v951_v21 = vpop.f32.mrb[7].mxu1  ;;  %v1065_v23 = vmax.f32 %v957_v16, 0.0  ;;  %v1113_v16 = vsel %vm1108_vm3, %v1994_v14, 0  ;;  %v1116_v14 = vsel %vm1108_vm3, %v1992_v13, 0 }
 0x254   : > { %v952_v22 = vadd.f32 %v1986_v11, %v951_v21  ;;  %v1063_v25 = vmax.f32 %v949_v18, 0.0 }
 0x255   : > { %v1066_v24 = vmax.f32 %v960_v20, 0.0 }
 0x256   : > { %v1064_v26 = vmax.f32 %v952_v22, 0.0 }
 0x257   : > { %v2000_v27 = vpack.c.bf16 %v1066_v24, %v1065_v23 }
 0x258   : > { %v2002_v28 = vpack.c.bf16 %v1064_v26, %v1063_v25  ;;  %v1510_v29 = vpop.f32.mrb[8].mxu1 }
 0x259   : > { %v973_v30 = vadd.f32 %v1510_v29, %v1986_v11  ;;  %v964_v31 = vpop.f32.mrb[9].mxu1 }
 0x25a   : > { %v965_v32 = vadd.f32 %v1986_v11, %v964_v31  ;;  %v1511_v33 = vpop.f32.mrb[10].mxu1 }
 0x25b   : > { %v976_v34 = vadd.f32 %v1511_v33, %v1986_v11  ;;  %v967_v35 = vpop.f32.mrb[11].mxu1  ;;  %v1069_v37 = vmax.f32 %v973_v30, 0.0 }
 0x25c   : > { %v968_v36 = vadd.f32 %v1986_v11, %v967_v35  ;;  %v1067_v39 = vmax.f32 %v965_v32, 0.0 }
 0x25d   : > { %v1070_v38 = vmax.f32 %v976_v34, 0.0 }
 0x25e   : > { %v1068_v40 = vmax.f32 %v968_v36, 0.0 }
 0x25f   : > { %v2008_v41 = vpack.c.bf16 %v1070_v38, %v1069_v37 }
 0x260   : > { %v2010_v42 = vpack.c.bf16 %v1068_v40, %v1067_v39  ;;  %v1514_v43 = vpop.f32.mrb[12].mxu1 }
 0x261   : > { %v989_v44 = vadd.f32 %v1514_v43, %v1986_v11  ;;  %v980_v45 = vpop.f32.mrb[13].mxu1 }
 0x262   : > { %v981_v46 = vadd.f32 %v1986_v11, %v980_v45  ;;  %v1515_v47 = vpop.f32.mrb[14].mxu1 }
 0x263   : > { %v992_v48 = vadd.f32 %v1515_v47, %v1986_v11  ;;  %v983_v49 = vpop.f32.mrb[15].mxu1  ;;  %v1073_v51 = vmax.f32 %v989_v44, 0.0 }
 0x264   : > { %v984_v50 = vadd.f32 %v1986_v11, %v983_v49  ;;  %v1071_v53 = vmax.f32 %v981_v46, 0.0  ;;  %v1119_v46 = vsel %vm1108_vm3, %v2002_v28, 0  ;;  %v1122_v28 = vsel %vm1108_vm3, %v2000_v27, 0 }
 0x265   : > { %v1074_v52 = vmax.f32 %v992_v48, 0.0 }
 0x266   : > { %v1072_v54 = vmax.f32 %v984_v50, 0.0 }
 0x267   : > { %v2016_v55 = vpack.c.bf16 %v1074_v52, %v1073_v51 }
 0x268   : > { %v2018_v56 = vpack.c.bf16 %v1072_v54, %v1071_v53  ;;  %v1518_v57 = vpop.f32.mrb[16].mxu1 }
 0x269   : > { %v1005_v58 = vadd.f32 %v1518_v57, %v1986_v11  ;;  %v996_v59 = vpop.f32.mrb[17].mxu1  ;;  %v1134_v27 = vsel %vm1108_vm3, %v2016_v55, 0 }
 0x26a   : > { %v997_v60 = vadd.f32 %v1986_v11, %v996_v59  ;;  %v1519_v62 = vpop.f32.mrb[18].mxu1 }
 0x26b   : > { %v1008_v63 = vadd.f32 %v1519_v62, %v1986_v11  ;;  %v999_v0 = vpop.f32.mrb[19].mxu1  ;;  %v1077_v2 = vmax.f32 %v1005_v58, 0.0  ;;  %v1128_v62 = vsel %vm1108_vm3, %v2008_v41, 0  ;;  %v1205_v41 = vpop.permute.xlu0 %1204 }
 0x26c   : > { %v1000_v1 = vadd.f32 %v1986_v11, %v999_v0  ;;  %v1075_v4 = vmax.f32 %v997_v60, 0.0  ;;  %v1125_v60 = vsel %vm1108_vm3, %v2010_v42, 0  ;;  %v1207_v42 = vlaneseq }
 0x26d   : > { %v1078_v3 = vmax.f32 %v1008_v63, 0.0 }
 0x26e   : > { %v1076_v5 = vmax.f32 %v1000_v1, 0.0  ;;  %v1208_v63 = vshrl.u32 %v1207_v42, 7  ;;  %vm1245_vm4 = vcmp.lt.s32.totalorder %v1207_v42, 256 }
 0x26f   : > { %v1101_v6 = vpack.c.bf16 %v1078_v3, %v1077_v2 }
 0x270   : > { %v1100_v7 = vpack.c.bf16 %v1076_v5, %v1075_v4  ;;  %v1522_v8 = vpop.f32.mrb[20].mxu1  ;;  %v1209_v0 = vsub.s32 0, %v1208_v63 }
 0x271   : > { %v1021_v9 = vadd.f32 %v1522_v8, %v1986_v11  ;;  %v1012_v10 = vpop.f32.mrb[21].mxu1 }
 0x272   : > { %v1013_v12 = vadd.f32 %v1986_v11, %v1012_v10  ;;  %1534 = vmatprep.subr.msk.bf16.mxu0 %vm1108_vm3, %v1100_v7  ;;  %v1523_v15 = vpop.f32.mrb[22].mxu1  ;;  %v1210_v1 = vrot.slane %v1205_v41, %v1209_v0 }
 0x273   : > { %v1081_v17 = vmax.f32 %v1021_v9, 0.0  ;;  %v1024_v18 = vadd.f32 %v1523_v15, %v1986_v11  ;;  %1435 = vmatpush3.bf16.xpose.msra.mxu0 %v1113_v16  ;;  %v1015_v19 = vpop.f32.mrb[23].mxu1 }
 0x274   : > { %v1079_v20 = vmax.f32 %v1013_v12, 0.0  ;;  %v1016_v21 = vadd.f32 %v1986_v11, %v1015_v19  ;;  %1535 = vmatprep.subr.msk.bf16.mxu0 %vm1108_vm3, %v1101_v6  ;;  %v1667_v12 = vmov 1966171168  }
 0x275   : > { %v1082_v22 = vmax.f32 %v1024_v18, 0.0  ;;  %v1229_v15 = vunpack.c.l.s4 %v1667_v12 }
 0x276   : > { %v1080_v23 = vmax.f32 %v1016_v21, 0.0 }
 0x277   : > { %v1103_v24 = vpack.c.bf16 %v1082_v22, %v1081_v17  ;;  %v1230_v16 = vunpack.c.0.s8 %v1229_v15 }
 0x278   : > { %v1102_v25 = vpack.c.bf16 %v1080_v23, %v1079_v20  ;;  %v1526_v26 = vpop.f32.mrb[24].mxu1 }
 0x279   : > { %v1037_v29 = vadd.f32 %v1526_v26, %v1986_v11  ;;  %v1028_v30 = vpop.f32.mrb[25].mxu1  ;;  %v1233_v18 = vsub.s32 %v1230_v16, %v1208_v63 }
 0x27a   : > { %v1029_v31 = vadd.f32 %v1986_v11, %v1028_v30  ;;  %v1527_v32 = vpop.f32.mrb[26].mxu1 }
 0x27b   : > { %1437 = vmatpush3.bf16.xpose.msra.mxu0 %v1116_v14  ;;  %v1085_v33 = vmax.f32 %v1037_v29, 0.0  ;;  %v1040_v34 = vadd.f32 %v1527_v32, %v1986_v11  ;;  %v1031_v35 = vpop.f32.mrb[27].mxu1 }
 0x27c   : > { %1536 = vmatprep.subr.msk.bf16.mxu0 %vm1108_vm3, %v1102_v25  ;;  %v1083_v36 = vmax.f32 %v1029_v31, 0.0  ;;  %v1032_v37 = vadd.f32 %v1986_v11, %v1031_v35 }
 0x27d   : > { %v1086_v38 = vmax.f32 %v1040_v34, 0.0 }
 0x27e   : > { %v1084_v39 = vmax.f32 %v1032_v37, 0.0 }
 0x27f   : > { %v1105_v40 = vpack.c.bf16 %v1086_v38, %v1085_v33 }
 0x280   : > { %v1104_v43 = vpack.c.bf16 %v1084_v39, %v1083_v36  ;;  %v1530_v44 = vpop.f32.mrb[28].mxu1 }
 0x281   : > { %v1053_v13 = vadd.f32 %v1530_v44, %v1986_v11  ;;  %v1044_v45 = vpop.f32.mrb[29].mxu1 }
 0x282   : > { %v1045_v47 = vadd.f32 %v1986_v11, %v1044_v45  ;;  %v1531_v48 = vpop.f32.mrb[30].mxu1 }
 0x283   : > { %1439 = vmatpush3.bf16.xpose.msra.mxu0 %v1119_v46  ;;  %v1089_v49 = vmax.f32 %v1053_v13, 0.0  ;;  %v1056_v50 = vadd.f32 %v1531_v48, %v1986_v11  ;;  %v1047_v51 = vpop.f32.mrb[31].mxu1 }
 0x284   : > { %1537 = vmatprep.subr.msk.bf16.mxu0 %vm1108_vm3, %v1103_v24  ;;  %v1087_v52 = vmax.f32 %v1045_v47, 0.0  ;;  %v1048_v53 = vadd.f32 %v1986_v11, %v1047_v51  ;;  %v1131_v11 = vsel %vm1108_vm3, %v2018_v56, 0 }
 0x285   : > { %v1090_v54 = vmax.f32 %v1056_v50, 0.0 }
 0x286   : > { %v1088_v57 = vmax.f32 %v1048_v53, 0.0 }
 0x287   : > { %v1107_v58 = vpack.c.bf16 %v1090_v54, %v1089_v49 }
 0x288   : > { %v1106_v59 = vpack.c.bf16 %v1088_v57, %v1087_v52 }
 0x28b   : > { %1441 = vmatpush3.bf16.xpose.msra.mxu0 %v1122_v28 }
 0x28c   : > { %1538 = vmatprep.subr.msk.bf16.mxu0 %vm1108_vm3, %v1104_v43 }
 0x293   : > { %1443 = vmatpush3.bf16.xpose.msra.mxu0 %v1125_v60 }
 0x294   : > { %1539 = vmatprep.subr.msk.bf16.mxu0 %vm1108_vm3, %v1105_v40 }
 0x29b   : > { %1445 = vmatpush3.bf16.xpose.msra.mxu0 %v1128_v62 }
 0x29c   : > { %1540 = vmatprep.subr.msk.bf16.mxu0 %vm1108_vm3, %v1106_v59 }
 0x2a3   : > { %1447 = vmatpush3.bf16.xpose.msra.mxu0 %v1131_v11 }
 0x2a4   : > { %1541 = vmatprep.subr.msk.bf16.mxu0 %vm1108_vm3, %v1107_v58 }
 0x2ab   : > { %1449 = vmatpush3.bf16.xpose.msra.mxu0 %v1134_v27 }
 0x2b2   : > { %1451 = vmatmul.mubr.msk.bf16.vlgmr.msra.gmra.mrb[32].mxu0 %vm1108_vm3, %v1979_v61 }
 0x385   : > { %v1194_v2 = vpop.f32.mrb[32].mxu0 }
 0x386   : > { %v1211_v3 = vadd.f32 %v1210_v1, %v1194_v2  ;;  %v1196_v4 = vpop.f32.mrb[33].mxu0 }
 0x387   : > { %v1212_v56 = vadd.f32 %v1210_v1, %v1196_v4  ;;  %v1198_v5 = vpop.f32.mrb[34].mxu0 }
 0x388   : > { %v1386_v6 = vmul.f32 -1.442695, %v1211_v3  ;;  %v1199_v7 = vpop.f32.mrb[35].mxu0 }
 0x389   : > { %v1387_v8 = vmul.f32 -1.442695, %v1212_v56 }
 0x38a   : > { %1593 = vpow2.f32 %v1386_v6 }
 0x38b   : > { %1595 = vpow2.f32 %v1387_v8 }
 0x394   : > { %v1594_v55 = vpop.eup %1593 }
 0x395   : > { %v1596_v9 = vpop.eup %1595  ;;  %v1219_v10 = vadd.f32 1.0, %v1594_v55 }
 0x396   : > { %v1220_v61 = vadd.f32 1.0, %v1596_v9 }
 0x397   : > { %1597 = vrcp.f32 %v1219_v10 }
 0x398   : > { %1599 = vrcp.f32 %v1220_v61 }
 0x3a1   : > { %v1598_v17 = vpop.eup %1597 }
 0x3a2   : > { %v1600_v19 = vpop.eup %1599 }
 0x3a3   : > { %v1227_v20 = vcombine.low %v1598_v17, %v1600_v19 }
 0x3a5   : > { %v1234_v21 = vrot.slane %v1227_v20, %v1233_v18 }
 0x3a7   : > { %v1241_v22 = vrot.slane %v1234_v21, %v1233_v18 }
 0x3a9   : > { %1247 = vst.msk [vmem:[%s317_s26] sm:$0x3] %vm1245_vm4, %v1241_v22 }
 0x3aa   : > { %1614 = shalt.err (!%p1611_p3)
}
 0x3ab   : > { %s1615_s18 = scalar_lea.hbm %s2067_s28, 32  ;;  %s1619_s22 = scalar_lea.hbm %s2117_s8, 64 }
 0x3ac   : > { %p1616_p4 = scmp.ne.s32.totalorder %s2067_s28, %s1615_s18  ;;  %p1620_p9 = scmp.lt.u32.totalorder %s2067_s28, %s2117_s8 }
 0x3ad   : > { %p1621_p10 = scmp.lt.u32.totalorder %s1619_s22, %s1615_s18  ;;  %p1623_p12 = scmp.lt.u32.totalorder %s1615_s18, %s2067_s28 }
 0x3ae   : > { %p1617_p7 = pnand %p1616_p4, %p1752_p5 }
 0x3af   : > { %p1622_p11 = por %p1621_p10, %p1620_p9 }
 0x3b0   : > { %p1618_p8 = pneg %p1617_p7 }
 0x3b1   : > { %p1624_p13 = por %p1623_p12, %p1622_p11 }
 0x3b3   : > { %p1625_p0 = pnand %p1624_p13, %p1618_p8 }
 0x3b5   : > { %1628 = shalt.err (!%p1625_p0)
}
 0x3b6   : > { %1542 = dma.vmem_to_hbm [thread:$0]  (%p1752_p5), %s2069_s27, 32, %s2067_s28, %s1249_s7  }
 0x3b7 PF: > { %p1548_p1 = scmp.ge.s32.totalorder %s1663_s10, 2  ;;  %s1275_s23 = sand.u32 1, %s1651_s29  }
 0x3b8   : > { %s1276_s24 = scalar_lea.sflag [#allocation4], %s1275_s23 }
 0x3b9   : > { %p1545_p2 = pnand %p1548_p1, %p1756_p6 }
 0x3bb   : > { %1646 = dma.done.wait (!%p1545_p2), %s1276_s24, 32  }
 0x3bc   : > { %1648 = vsyncadd (!%p1545_p2), %s1276_s24, 4294967264  ;;  %p20_p3 = scmp.ge.s32.totalorder %s1740_s12, 4   ;;  %s2120_s29 = smov %s1655_s30 }
 0x3bd   : > { %s2121_s30 = smov %s1659_s9  ;;  %s2122_s9 = smov %s1750_s15 }
 0x3be   : > { %s2123_s10 = smov %s1740_s12  ;;  %22 = sbr.rel (!%p20_p3) target bundleno = 6 (0x6), region = 90 }
 0x3c5   :  { %1281 = vsyncpa [#allocation4], 1 }
 0x3c6   :  { %1283 = vsyncpa [#allocation4 + $0x1], 1 }

</bundles_post_ra>
